<compile_context>
chip_gen: v7x
topology: tpu7x:2x2x1
jax: 0.10.0
libtpu: 0.0.40
codegen_flags: <defaults>
</compile_context>

<pallas_src>
import jax
import jax.numpy as jnp
from jax.experimental import pallas as pl
from jax.experimental.pallas import tpu as pltpu

# ---- synthetic (small) model dimensions, analogous to the module's params ----
BATCH = 8

TEXT_DIM = 64        # stands in for BERT's 768-d pooler_output
VIS_DIM = 128        # stands in for VGG19's 4096-d feature
TEXT_FC1_OUT = 128   # model_params['text_fc1_out'] (2742 in the original)
TEXT_FC2_OUT = 32    # model_params['text_fc2_out']
IMG_FC1_OUT = 128    # model_params['img_fc1_out']
IMG_FC2_OUT = 32     # model_params['img_fc2_out']
FUSION_OUT = 64      # model_params['fusion_output_size']

IN_PAD = 256         # lane width of the input slab / layer-0 N / layer-1 K
IN_HALF = 128        # lane width of layer-1 N / layer-2 K,N / layer-3 K
EPS_OFF = TEXT_DIM + VIS_DIM          # eps lanes of the input slab (192:256)
OUT_PAD = 2 * FUSION_OUT              # packed output width (128)

# ---- packed parameter-buffer layout (bf16, one (P_ROWS, 256) array) ----
#   rows   0:256, cols   0:256  -> W0: block-diag [wt1 ; wv1]   (K=256, N=256)
#   rows 256:512, cols   0:128  -> W1: block-diag [wt2 ; wv2]   (K=256, N=128)
#   rows 256:384, cols 128:256  -> W2: fusion                   (K=128, N=128)
#   rows 512:640, cols   0:256  -> W3: [alpha | mu | logvar]    (K=128, N=256)
#   rows 640:656                -> bias rows + fc weight row + fc bias
W0_R0 = 0
W1_R0 = 256
W2_R0 = 256
W3_R0 = 512
BIAS_R0 = 640
BIAS_ROWS = 16       # 16 rows so the bias block is bf16-tile aligned
P_ROWS = BIAS_R0 + BIAS_ROWS          # 656


def _head_kernel(x_ref, p_ref, out_ref):
    """One fused pass over a batch tile.

    x_ref  : (Bt, IN_PAD)   f32   [text | vision | eps] lane-packed
    p_ref  : (P_ROWS, 256)  bf16  packed weights + biases (see layout above)
    out_ref: (Bt, OUT_PAD)  f32   [alpha_smoothed | broadcast(prediction)]
    """
    f32 = jnp.float32
    bf16 = jnp.bfloat16

    x = x_ref[...]                                            # (Bt, 256) f32
    eps = x[:, EPS_OFF:EPS_OFF + FUSION_OUT]                  # (Bt, 64)

    # One tile-aligned load of the bias block; epilogue math in f32.
    bias = p_ref[BIAS_R0:BIAS_R0 + BIAS_ROWS, :].astype(f32)  # (16, 256)
    b1 = bias[0:1, :]                                         # fc1 biases
    b2 = bias[1:2, 0:IN_HALF]                                 # fc2 biases
    bfu = bias[2:3, 0:IN_HALF]                                # fusion bias
    baml = bias[3:4, :]                                       # alpha|mu|logvar biases
    wfc_row = bias[4:5, 0:FUSION_OUT]                         # fc weight as a row
    bfc = bias[5:6, 0:1]                                      # fc bias

    # --- 4 MXU matmuls: bf16 operands, f32 accumulation (dropout = identity) ---
    # fc1 (text & vision fused via block-diagonal weight)
    h1 = jnp.maximum(
        jnp.dot(x.astype(bf16), p_ref[W0_R0:W0_R0 + IN_PAD, :],
                preferred_element_type=f32) + b1, 0.0)        # (Bt, 256)
    # fc2 (block-diagonal); lanes 0:64 == concat([text_feat, img_feat]), 64:128 zero
    h2 = jnp.maximum(
        jnp.dot(h1.astype(bf16), p_ref[W1_R0:W1_R0 + IN_PAD, 0:IN_HALF],
                preferred_element_type=f32) + b2, 0.0)        # (Bt, 128)
    # fusion linear + relu; lanes 0:64 live, 64:128 exact zeros
    fused_full = jnp.maximum(
        jnp.dot(h2.astype(bf16), p_ref[W2_R0:W2_R0 + IN_HALF, IN_HALF:IN_PAD],
                preferred_element_type=f32) + bfu, 0.0)       # (Bt, 128)
    # alpha | mu | logvar merged into one matmul
    aml = jnp.dot(fused_full.astype(bf16), p_ref[W3_R0:W3_R0 + IN_HALF, :],
                  preferred_element_type=f32) + baml          # (Bt, 256)

    fused_ = fused_full[:, 0:FUSION_OUT]
    alpha = aml[:, 0:FUSION_OUT]
    mu = aml[:, FUSION_OUT:2 * FUSION_OUT]
    logvar = aml[:, 2 * FUSION_OUT:3 * FUSION_OUT]

    # --- reparameterize: std = exp(logvar) (matches reference; no 0.5 factor) ---
    std = jnp.exp(logvar)
    alpha_smoothed = eps * std + mu + alpha

    # softmax along the feature axis; EUP approx reciprocal for the denominator
    m = jnp.max(alpha_smoothed, axis=1, keepdims=True)
    e = jnp.exp(alpha_smoothed - m)
    rho = e * pl.reciprocal(jnp.sum(e, axis=1, keepdims=True), approx=True)

    # --- residual mix + final N=1 classifier as VPU multiply + lane reduction ---
    fused = 0.4 * fused_ + 0.6 * rho
    logit = jnp.sum(fused * wfc_row, axis=1, keepdims=True) + bfc
    pred = jnp.clip(pl.reciprocal(1.0 + jnp.exp(-logit), approx=True), 0.0, 1.0)

    out_ref[:, 0:FUSION_OUT] = alpha_smoothed
    out_ref[:, FUSION_OUT:OUT_PAD] = jnp.broadcast_to(
        pred, (pred.shape[0], FUSION_OUT))


def _pick_batch_tile(batch):
    """8 rows at tiny batches; up to 128 rows per step at larger batches, with
    >= 2 grid steps whenever batch > 8 so v7x's two TensorCores both get work."""
    if batch <= 8:
        return 8
    half = (batch + 1) // 2
    return min(128, ((half + 7) // 8) * 8)


@jax.jit
def text_concat_vision_forward(text_feat, img_feat, eps, p_buf):
    """Runs the fused head. Returns (prediction (B,), alpha_smoothed (B, FUSION_OUT))."""
    # Pack [text | vision | eps] into one 256-lane slab (single activation DMA).
    # TODO(synk): at large batch, pre-pack this slab outside the hot path (or pass
    # the three tensors as separate kernel inputs) to avoid an extra HBM pass.
    x = jnp.concatenate([text_feat, img_feat, eps], axis=1).astype(jnp.float32)
    batch = x.shape[0]

    bt = _pick_batch_tile(batch)
    n_tiles = pl.cdiv(batch, bt)
    padded = n_tiles * bt
    if padded != batch:
        x = jnp.pad(x, ((0, padded - batch), (0, 0)))

    out = pl.pallas_call(
        _head_kernel,
        grid=(n_tiles,),
        in_specs=[
            pl.BlockSpec((bt, IN_PAD), lambda i: (i, 0)),
            # Grid-invariant param buffer (index_map constant -> fetched once).
            # At the scaled-up real dims this spec should additionally be
            # single-buffered (pipeline_mode=pl.Buffered(1)) and K-tiled.
            pl.BlockSpec((P_ROWS, IN_PAD), lambda i: (0, 0)),
        ],
        out_specs=pl.BlockSpec((bt, OUT_PAD), lambda i: (i, 0)),
        out_shape=jax.ShapeDtypeStruct((padded, OUT_PAD), jnp.float32),
        compiler_params=pltpu.CompilerParams(
            dimension_semantics=("parallel",)),   # batch tiles -> both TCs on v7x
    )(x, p_buf)

    alpha_smoothed = out[:batch, 0:FUSION_OUT]
    prediction = out[:batch, FUSION_OUT]
    return prediction, alpha_smoothed


def _init_linear(key, fan_in, fan_out):
    """Deterministic init; returns (W (in,out), b (1,out)) so math is x @ W + b,
    matching PyTorch's y = x @ W.T + b semantics."""
    kw, kb = jax.random.split(key)
    scale = 1.0 / jnp.sqrt(jnp.float32(fan_in))
    w = jax.random.uniform(kw, (fan_in, fan_out), jnp.float32, -scale, scale)
    b = jax.random.uniform(kb, (1, fan_out), jnp.float32, -scale, scale)
    return w, b


def make_params(key):
    keys = jax.random.split(key, 9)
    wt1, bt1 = _init_linear(keys[0], TEXT_DIM, TEXT_FC1_OUT)       # text_enc_fc1
    wt2, bt2 = _init_linear(keys[1], TEXT_FC1_OUT, TEXT_FC2_OUT)   # text_enc_fc2
    wv1, bv1 = _init_linear(keys[2], VIS_DIM, IMG_FC1_OUT)         # vis_enc_fc1
    wv2, bv2 = _init_linear(keys[3], IMG_FC1_OUT, IMG_FC2_OUT)     # vis_enc_fc2
    wf, bf = _init_linear(keys[4], TEXT_FC2_OUT + IMG_FC2_OUT, FUSION_OUT)  # fusion
    wa, ba = _init_linear(keys[5], FUSION_OUT, FUSION_OUT)         # alpha
    wm, bm = _init_linear(keys[6], FUSION_OUT, FUSION_OUT)         # mu
    wl, bl = _init_linear(keys[7], FUSION_OUT, FUSION_OUT)         # logvar
    wfc, bfc = _init_linear(keys[8], FUSION_OUT, 1)                # fc
    return (wt1, bt1, wt2, bt2, wv1, bv1, wv2, bv2,
            wf, bf, wa, ba, wm, bm, wl, bl, wfc, bfc)


def pack_params(params):
    """One-time host-side packing of all head parameters into a single flat,
    lane-dense bf16 buffer (weights at minimal 128-granular shapes + bias rows).
    NOTE: the pad lanes of the bias rows must stay exactly zero — the padding
    scheme relies on relu(0 + 0) == 0 keeping h2/fused_full pad lanes zero."""
    (wt1, bt1, wt2, bt2, wv1, bv1, wv2, bv2,
     wf, bf, wa, ba, wm, bm, wl, bl, wfc, bfc) = params

    p = jnp.zeros((P_ROWS, IN_PAD), jnp.float32)

    # layer 0 (K=256, N=256): block-diag [wt1 ; wv1]; eps rows 192:256 stay zero
    p = p.at[W0_R0:W0_R0 + TEXT_DIM, 0:TEXT_FC1_OUT].set(wt1)
    p = p.at[W0_R0 + TEXT_DIM:W0_R0 + TEXT_DIM + VIS_DIM,
             TEXT_FC1_OUT:TEXT_FC1_OUT + IMG_FC1_OUT].set(wv1)
    # layer 1 (K=256, N=128), cols 0:128: block-diag [wt2 ; wv2]
    p = p.at[W1_R0:W1_R0 + TEXT_FC1_OUT, 0:TEXT_FC2_OUT].set(wt2)
    p = p.at[W1_R0 + TEXT_FC1_OUT:W1_R0 + TEXT_FC1_OUT + IMG_FC1_OUT,
             TEXT_FC2_OUT:TEXT_FC2_OUT + IMG_FC2_OUT].set(wv2)
    # layer 2 (K=128, N=128), rows 256:384, cols 128:256: fusion
    p = p.at[W2_R0:W2_R0 + TEXT_FC2_OUT + IMG_FC2_OUT,
             IN_HALF:IN_HALF + FUSION_OUT].set(wf)
    # layer 3 (K=128, N=256): alpha | mu | logvar hstacked
    p = p.at[W3_R0:W3_R0 + FUSION_OUT, 0:FUSION_OUT].set(wa)
    p = p.at[W3_R0:W3_R0 + FUSION_OUT, FUSION_OUT:2 * FUSION_OUT].set(wm)
    p = p.at[W3_R0:W3_R0 + FUSION_OUT, 2 * FUSION_OUT:3 * FUSION_OUT].set(wl)

    # bias / fc rows (16-row, bf16-tile-aligned block)
    r = BIAS_R0
    p = p.at[r + 0, 0:TEXT_FC1_OUT].set(bt1[0])
    p = p.at[r + 0, TEXT_FC1_OUT:TEXT_FC1_OUT + IMG_FC1_OUT].set(bv1[0])
    p = p.at[r + 1, 0:TEXT_FC2_OUT].set(bt2[0])
    p = p.at[r + 1, TEXT_FC2_OUT:TEXT_FC2_OUT + IMG_FC2_OUT].set(bv2[0])
    p = p.at[r + 2, 0:FUSION_OUT].set(bf[0])
    p = p.at[r + 3, 0:FUSION_OUT].set(ba[0])
    p = p.at[r + 3, FUSION_OUT:2 * FUSION_OUT].set(bm[0])
    p = p.at[r + 3, 2 * FUSION_OUT:3 * FUSION_OUT].set(bl[0])
    p = p.at[r + 4, 0:FUSION_OUT].set(wfc[:, 0])   # fc weight as a row
    p = p.at[r + 5, 0].set(bfc[0, 0])              # fc bias

    # bf16 storage halves the dominant HBM weight traffic; the kernel
    # accumulates the matmuls in f32 and keeps the epilogue in f32.
    return p.astype(jnp.bfloat16)


def reference_forward(text_feat, img_feat, eps, params):
    """Plain-JAX reference of the PyTorch forward (dropout = identity)."""
    (wt1, bt1, wt2, bt2, wv1, bv1, wv2, bv2,
     wf, bf, wa, ba, wm, bm, wl, bl, wfc, bfc) = params
    t = jax.nn.relu(text_feat @ wt1 + bt1)
    t = jax.nn.relu(t @ wt2 + bt2)
    v = jax.nn.relu(img_feat @ wv1 + bv1)
    v = jax.nn.relu(v @ wv2 + bv2)
    comb = jnp.concatenate([t, v], axis=1)
    fused_ = jax.nn.relu(comb @ wf + bf)
    alpha = fused_ @ wa + ba
    mu = fused_ @ wm + bm
    logvar = fused_ @ wl + bl
    std = jnp.exp(logvar)
    alpha_smoothed = eps * std + mu + alpha
    rho = jax.nn.softmax(alpha_smoothed, axis=1)
    fused = 0.4 * fused_ + 0.6 * rho
    pred = jax.nn.sigmoid(fused @ wfc + bfc)
    return pred[:, 0], alpha_smoothed


if __name__ == "__main__":
    root = jax.random.PRNGKey(0)
    k_text, k_img, k_eps, k_params = jax.random.split(root, 4)

    # surrogate backbone features (BERT pooler_output / VGG19 4096-d vector)
    text_feat = jax.random.normal(k_text, (BATCH, TEXT_DIM), jnp.float32)
    img_feat = jax.random.normal(k_img, (BATCH, VIS_DIM), jnp.float32)
    # eps ~ N(0,1) for the reparameterization trick (torch.randn_like(std))
    eps = jax.random.normal(k_eps, (BATCH, FUSION_OUT), jnp.float32)

    params = make_params(k_params)
    p_buf = pack_params(params)   # one-time packing into a single bf16 buffer

    prediction, alpha_smoothed = text_concat_vision_forward(
        text_feat, img_feat, eps, p_buf)
    jax.block_until_ready((prediction, alpha_smoothed))

    assert prediction.shape == (BATCH,)
    assert alpha_smoothed.shape == (BATCH, FUSION_OUT)
    assert bool(jnp.all(jnp.isfinite(prediction)))
    assert bool(jnp.all(jnp.isfinite(alpha_smoothed)))
    assert bool(jnp.all((prediction >= 0.0) & (prediction <= 1.0)))

    # Loose structural check vs a plain-JAX f32 reference (tolerant of the bf16
    # weight storage, MXU f32 accumulation and approx EUP reciprocals in-kernel).
    ref_pred, ref_alpha = reference_forward(text_feat, img_feat, eps, params)

    def _close(a, b, tol=0.05):
        return bool(jnp.max(jnp.abs(a - b)) <= tol * (1.0 + jnp.max(jnp.abs(b))))

    assert _close(alpha_smoothed, ref_alpha)
    assert _close(prediction, ref_pred)

    print("KERNEL_OK")
</pallas_src>

<mosaic_0001>
module attributes {stable_mosaic.version = 11 : i64} {
  func.func @_head_kernel(%arg0: i32, %arg1: memref<8x256xf32, #tpu.memory_space<vmem>>, %arg2: memref<656x256xbf16, #tpu.memory_space<vmem>>, %arg3: memref<8x128xf32, #tpu.memory_space<vmem>>) attributes {dimension_semantics = [#tpu.dimension_semantics<parallel>], iteration_bounds = array<i64: 1>, scalar_prefetch = 0 : i64, scratch_operands = 0 : i64, tpu.core_type = #tpu.core_type<tc>, window_params = [{transform_indices = @transform_0, window_bounds = array<i64: 8, 256>}, {pipeline_mode = #tpu.pipeline_mode<synchronous>, transform_indices = @transform_1, window_bounds = array<i64: 656, 256>}, {transform_indices = @transform_2, window_bounds = array<i64: 8, 128>}]} {
    %c0 = arith.constant 0 : index
    %c0_0 = arith.constant 0 : index
    %0 = vector.load %arg1[%c0, %c0_0] : memref<8x256xf32, #tpu.memory_space<vmem>>, vector<8x256xf32>
    %1 = vector.extract_strided_slice %0 {offsets = [0, 192], sizes = [8, 64], strides = [1, 1]} : vector<8x256xf32> to vector<8x64xf32>
    %c640 = arith.constant 640 : index
    %c0_1 = arith.constant 0 : index
    %2 = vector.load %arg2[%c640, %c0_1] : memref<656x256xbf16, #tpu.memory_space<vmem>>, vector<16x256xbf16>
    %3 = arith.extf %2 : vector<16x256xbf16> to vector<16x256xf32>
    %4 = vector.extract_strided_slice %3 {offsets = [0, 0], sizes = [1, 256], strides = [1, 1]} : vector<16x256xf32> to vector<1x256xf32>
    %5 = vector.extract_strided_slice %3 {offsets = [1, 0], sizes = [1, 128], strides = [1, 1]} : vector<16x256xf32> to vector<1x128xf32>
    %6 = vector.extract_strided_slice %3 {offsets = [2, 0], sizes = [1, 128], strides = [1, 1]} : vector<16x256xf32> to vector<1x128xf32>
    %7 = vector.extract_strided_slice %3 {offsets = [3, 0], sizes = [1, 256], strides = [1, 1]} : vector<16x256xf32> to vector<1x256xf32>
    %8 = vector.extract_strided_slice %3 {offsets = [4, 0], sizes = [1, 64], strides = [1, 1]} : vector<16x256xf32> to vector<1x64xf32>
    %9 = vector.extract_strided_slice %3 {offsets = [5, 0], sizes = [1, 1], strides = [1, 1]} : vector<16x256xf32> to vector<1x1xf32>
    %10 = arith.truncf %0 : vector<8x256xf32> to vector<8x256xbf16>
    %c0_2 = arith.constant 0 : index
    %c0_3 = arith.constant 0 : index
    %11 = vector.load %arg2[%c0_2, %c0_3] : memref<656x256xbf16, #tpu.memory_space<vmem>>, vector<256x256xbf16>
    %cst = arith.constant dense<0.000000e+00> : vector<8x256xf32>
    %12 = tpu.matmul %10, %11, %cst {dimension_numbers = #tpu.dot_dimension_numbers<[1], [0], [0], [1], [0, 0, 1, 1], [], []>} : vector<8x256xbf16>, vector<256x256xbf16>, vector<8x256xf32> -> vector<8x256xf32>
    %13 = vector.broadcast %4 : vector<1x256xf32> to vector<8x256xf32>
    %14 = arith.addf %12, %13 : vector<8x256xf32>
    %cst_4 = arith.constant 0.000000e+00 : f32
    %15 = vector.broadcast %cst_4 : f32 to vector<8x256xf32>
    %16 = arith.maximumf %14, %15 : vector<8x256xf32>
    %17 = arith.truncf %16 : vector<8x256xf32> to vector<8x256xbf16>
    %c256 = arith.constant 256 : index
    %c0_5 = arith.constant 0 : index
    %18 = vector.load %arg2[%c256, %c0_5] : memref<656x256xbf16, #tpu.memory_space<vmem>>, vector<256x128xbf16>
    %cst_6 = arith.constant dense<0.000000e+00> : vector<8x128xf32>
    %19 = tpu.matmul %17, %18, %cst_6 {dimension_numbers = #tpu.dot_dimension_numbers<[1], [0], [0], [1], [0, 0, 1, 1], [], []>} : vector<8x256xbf16>, vector<256x128xbf16>, vector<8x128xf32> -> vector<8x128xf32>
    %20 = vector.broadcast %5 : vector<1x128xf32> to vector<8x128xf32>
    %21 = arith.addf %19, %20 : vector<8x128xf32>
    %cst_7 = arith.constant 0.000000e+00 : f32
    %22 = vector.broadcast %cst_7 : f32 to vector<8x128xf32>
    %23 = arith.maximumf %21, %22 : vector<8x128xf32>
    %24 = arith.truncf %23 : vector<8x128xf32> to vector<8x128xbf16>
    %c256_8 = arith.constant 256 : index
    %c128 = arith.constant 128 : index
    %25 = vector.load %arg2[%c256_8, %c128] : memref<656x256xbf16, #tpu.memory_space<vmem>>, vector<128x128xbf16>
    %cst_9 = arith.constant dense<0.000000e+00> : vector<8x128xf32>
    %26 = tpu.matmul %24, %25, %cst_9 {dimension_numbers = #tpu.dot_dimension_numbers<[1], [0], [0], [1], [0, 0, 1, 1], [], []>} : vector<8x128xbf16>, vector<128x128xbf16>, vector<8x128xf32> -> vector<8x128xf32>
    %27 = vector.broadcast %6 : vector<1x128xf32> to vector<8x128xf32>
    %28 = arith.addf %26, %27 : vector<8x128xf32>
    %cst_10 = arith.constant 0.000000e+00 : f32
    %29 = vector.broadcast %cst_10 : f32 to vector<8x128xf32>
    %30 = arith.maximumf %28, %29 : vector<8x128xf32>
    %31 = arith.truncf %30 : vector<8x128xf32> to vector<8x128xbf16>
    %c512 = arith.constant 512 : index
    %c0_11 = arith.constant 0 : index
    %32 = vector.load %arg2[%c512, %c0_11] : memref<656x256xbf16, #tpu.memory_space<vmem>>, vector<128x256xbf16>
    %cst_12 = arith.constant dense<0.000000e+00> : vector<8x256xf32>
    %33 = tpu.matmul %31, %32, %cst_12 {dimension_numbers = #tpu.dot_dimension_numbers<[1], [0], [0], [1], [0, 0, 1, 1], [], []>} : vector<8x128xbf16>, vector<128x256xbf16>, vector<8x256xf32> -> vector<8x256xf32>
    %34 = vector.broadcast %7 : vector<1x256xf32> to vector<8x256xf32>
    %35 = arith.addf %33, %34 : vector<8x256xf32>
    %36 = vector.extract_strided_slice %30 {offsets = [0, 0], sizes = [8, 64], strides = [1, 1]} : vector<8x128xf32> to vector<8x64xf32>
    %37 = vector.extract_strided_slice %35 {offsets = [0, 0], sizes = [8, 64], strides = [1, 1]} : vector<8x256xf32> to vector<8x64xf32>
    %38 = vector.extract_strided_slice %35 {offsets = [0, 64], sizes = [8, 64], strides = [1, 1]} : vector<8x256xf32> to vector<8x64xf32>
    %39 = vector.extract_strided_slice %35 {offsets = [0, 128], sizes = [8, 64], strides = [1, 1]} : vector<8x256xf32> to vector<8x64xf32>
    %40 = math.exp %39 : vector<8x64xf32>
    %41 = arith.mulf %1, %40 : vector<8x64xf32>
    %42 = arith.addf %41, %38 : vector<8x64xf32>
    %43 = arith.addf %42, %37 : vector<8x64xf32>
    %cst_13 = arith.constant dense<0xFF800000> : vector<8xf32>
    %44 = vector.multi_reduction <maximumf>, %43, %cst_13 [1] : vector<8x64xf32> to vector<8xf32>
    %45 = vector.shape_cast %44 : vector<8xf32> to vector<8x1xf32>
    %46 = vector.broadcast %45 : vector<8x1xf32> to vector<8x64xf32>
    %47 = arith.subf %43, %46 : vector<8x64xf32>
    %48 = math.exp %47 : vector<8x64xf32>
    %cst_14 = arith.constant dense<0.000000e+00> : vector<8xf32>
    %49 = vector.multi_reduction <add>, %48, %cst_14 [1] : vector<8x64xf32> to vector<8xf32>
    %50 = vector.shape_cast %49 : vector<8xf32> to vector<8x1xf32>
    %51 = tpu.reciprocal %50 {approx = true} : vector<8x1xf32> -> vector<8x1xf32>
    %52 = vector.broadcast %51 : vector<8x1xf32> to vector<8x64xf32>
    %53 = arith.mulf %48, %52 : vector<8x64xf32>
    %cst_15 = arith.constant 4.000000e-01 : f32
    %54 = vector.broadcast %cst_15 : f32 to vector<8x64xf32>
    %55 = arith.mulf %54, %36 : vector<8x64xf32>
    %cst_16 = arith.constant 6.000000e-01 : f32
    %56 = vector.broadcast %cst_16 : f32 to vector<8x64xf32>
    %57 = arith.mulf %56, %53 : vector<8x64xf32>
    %58 = arith.addf %55, %57 : vector<8x64xf32>
    %59 = vector.broadcast %8 : vector<1x64xf32> to vector<8x64xf32>
    %60 = arith.mulf %58, %59 : vector<8x64xf32>
    %cst_17 = arith.constant dense<0.000000e+00> : vector<8xf32>
    %61 = vector.multi_reduction <add>, %60, %cst_17 [1] : vector<8x64xf32> to vector<8xf32>
    %62 = vector.shape_cast %61 : vector<8xf32> to vector<8x1xf32>
    %63 = vector.broadcast %9 : vector<1x1xf32> to vector<8x1xf32>
    %64 = arith.addf %62, %63 : vector<8x1xf32>
    %cst_18 = arith.constant 0.000000e+00 : f32
    %65 = vector.broadcast %cst_18 : f32 to vector<8x1xf32>
    %66 = arith.subf %65, %64 : vector<8x1xf32>
    %67 = math.exp %66 : vector<8x1xf32>
    %cst_19 = arith.constant 1.000000e+00 : f32
    %68 = vector.broadcast %cst_19 : f32 to vector<8x1xf32>
    %69 = arith.addf %68, %67 : vector<8x1xf32>
    %70 = tpu.reciprocal %69 {approx = true} : vector<8x1xf32> -> vector<8x1xf32>
    %cst_20 = arith.constant 0.000000e+00 : f32
    %cst_21 = arith.constant 1.000000e+00 : f32
    %71 = vector.broadcast %cst_20 : f32 to vector<8x1xf32>
    %72 = arith.maximumf %71, %70 : vector<8x1xf32>
    %73 = vector.broadcast %cst_21 : f32 to vector<8x1xf32>
    %74 = arith.minimumf %73, %72 : vector<8x1xf32>
    %c0_22 = arith.constant 0 : index
    %c0_23 = arith.constant 0 : index
    %75 = vector.load %arg3[%c0_22, %c0_23] : memref<8x128xf32, #tpu.memory_space<vmem>>, vector<8x64xf32>
    tpu.vector_store %arg3[%c0_22, %c0_23], %43 {strides = array<i32>} : memref<8x128xf32, #tpu.memory_space<vmem>>, vector<8x64xf32>,
    %76 = vector.shape_cast %74 : vector<8x1xf32> to vector<8x1xf32>
    %77 = vector.broadcast %76 : vector<8x1xf32> to vector<8x64xf32>
    %c0_24 = arith.constant 0 : index
    %c64 = arith.constant 64 : index
    %78 = vector.load %arg3[%c0_24, %c64] : memref<8x128xf32, #tpu.memory_space<vmem>>, vector<8x64xf32>
    tpu.vector_store %arg3[%c0_24, %c64], %77 {strides = array<i32>} : memref<8x128xf32, #tpu.memory_space<vmem>>, vector<8x64xf32>,
    return
  }
  func.func @transform_0(%arg0: i32) -> (i32, i32) {
    %c0_i32 = arith.constant 0 : i32
    %c0_i32_0 = arith.constant 0 : i32
    return %arg0, %c0_i32 : i32, i32
  }
  func.func @transform_1(%arg0: i32) -> (i32, i32) {
    %c0_i32 = arith.constant 0 : i32
    %c0_i32_0 = arith.constant 0 : i32
    %c0_i32_1 = arith.constant 0 : i32
    return %c0_i32, %c0_i32_0 : i32, i32
  }
  func.func @transform_2(%arg0: i32) -> (i32, i32) {
    %c0_i32 = arith.constant 0 : i32
    %c0_i32_0 = arith.constant 0 : i32
    return %arg0, %c0_i32 : i32, i32
  }
}

</mosaic_0001>

<bundles_post_ra>
// kernel: text_concat_vision_forward.1
= control target key start
LH: loop header
LB: loop body
LE: loop exit
PB: predicated region body
PF: predicated region fallthrough
CT: control target
= control target key end

     0   :  { %7 = vsyncpa [#allocation3], 0  ;;  %s1041_s9 = smov [#allocation2]   ;;  %s1126_s0 = inlined_call_operand.vmem [shape: f32[8,256], index: 0, kind: input, shape index: {}]   ;;  %s1127_s1 = inlined_call_operand.hbm [shape: bf16[656,256], index: 1, kind: input, shape index: {}]   ;;  %s1128_s2 = inlined_call_operand.vmem [shape: f32[8,128], index: 2, kind: output, shape index: {}]  }
   0x1   :  { %s15_s10 = sshll.u32 %s1041_s9, 4  ;;  %s1017_s13 = scalar_lea.hbm %s1127_s1, 10496  ;;  %s16_s10 = int_to_ptr.vmem [resolvable:$true] %s15_s10 }
   0x2   :  { %p1018_p0 = scmp.ne.s32.totalorder %s1127_s1, %s1017_s13  ;;  %p1021_p1 = scmp.lt.u32.totalorder %s1017_s13, %s1127_s1 }
   0x4   :  { %p1023_p2 = pnand %p1021_p1, %p1018_p0 }
   0x6   :  { %1026 = shalt.err (!%p1023_p2)
}
   0x7   :  { %s1027_s18 = scalar_lea.vmem %s16_s10, 10496  ;;  %p1032_p4 = scmp.lt.s32.totalorder %s16_s10, %s16_s10 }
   0x8   :  { %p1028_p3 = scmp.ne.s32.totalorder %s16_s10, %s1027_s18  ;;  %p1033_p5 = scmp.lt.s32.totalorder %s1027_s18, %s1027_s18 }
   0xa   :  { %p1034_p6 = por %p1033_p5, %p1032_p4 }
   0xc   :  { %p1035_p7 = pnand %p1034_p6, %p1028_p3 }
   0xe   :  { %1038 = shalt.err (!%p1035_p7)
}
   0xf   :  { %s1042_s19 = smov 128   ;;  %s1043_s20 = smov 8  }
  0x10   :  { %21 = dma.hbm_to_vmem [thread:$0]  %s1127_s1, 10496, %s16_s10, [#allocation3], %s1042_s19, %s1042_s19, %s1043_s20  }
  0x11   :  { %1039 = dma.done.wait [#allocation3], 10496  }
  0x12   :  { %1040 = vsyncadd [#allocation3], 4294956800  ;;  %v911_v0 = vld [vmem:[#allocation2 + $0x4] ss:$8 sps:$4 sm:$0xff]   ;;  %v913_v1 = vld [vmem:[#allocation2] ss:$8 sps:$4 sm:$0xff]   ;;  %v65_v53 = vlaneseq }
  0x13   :  { %233 = vmatprep.subr.bf16.mxu0 %v911_v0  ;;  %v914_v2 = vld [vmem:[#allocation2 + $0x14] ss:$8 sps:$4 sm:$0xff]   ;;  %v916_v3 = vld [vmem:[#allocation2 + $0x10] ss:$8 sps:$4 sm:$0xff]   ;;  %v917_v4 = vld [vmem:[#allocation2 + $0x24] ss:$8 sps:$4 sm:$0xff]  }
  0x14   :  { %234 = vmatpush1.bf16.msra.mxu0 %v913_v1  ;;  %v919_v5 = vld [vmem:[#allocation2 + $0x20] ss:$8 sps:$4 sm:$0xff]   ;;  %v920_v6 = vld [vmem:[#allocation2 + $0x34] ss:$8 sps:$4 sm:$0xff]   ;;  %v922_v7 = vld [vmem:[#allocation2 + $0x30] ss:$8 sps:$4 sm:$0xff]  }
  0x15   :  { %235 = vmatprep.subr.bf16.mxu0 %v914_v2  ;;  %v923_v8 = vld [vmem:[#allocation2 + $0x44] ss:$8 sps:$4 sm:$0xff]   ;;  %v925_v9 = vld [vmem:[#allocation2 + $0x40] ss:$8 sps:$4 sm:$0xff]   ;;  %v926_v10 = vld [vmem:[#allocation2 + $0x54] ss:$8 sps:$4 sm:$0xff]  }
  0x16   :  { %v928_v11 = vld [vmem:[#allocation2 + $0x50] ss:$8 sps:$4 sm:$0xff]   ;;  %v929_v12 = vld [vmem:[#allocation2 + $0x64] ss:$8 sps:$4 sm:$0xff]   ;;  %v931_v13 = vld [vmem:[#allocation2 + $0x60] ss:$8 sps:$4 sm:$0xff]  }
  0x17   :  { %v1078_v14 = vld [vmem:[%s1126_s0 + $0x8] sm:$0xff]  ;;  %v932_v15 = vld [vmem:[#allocation2 + $0x74] ss:$8 sps:$4 sm:$0xff]   ;;  %v961_v19 = vld [vmem:[#allocation2 + $0x190] ss:$8 sps:$4 sm:$0xff]   ;;  %v1044_v52 = vmov 0.0  }
  0x18   :  { %236 = vmatpush1.bf16.msra.mxu0 %v916_v3  ;;  %v32_v16 = vpack.c.bf16 %v1078_v14, %v1078_v14  ;;  %v959_v17 = vld [vmem:[#allocation2 + $0x180] ss:$8 sps:$4 sm:$0xff]   ;;  %v934_v20 = vld [vmem:[#allocation2 + $0x70] ss:$8 sps:$4 sm:$0xff]   ;;  %v935_v23 = vld [vmem:[#allocation2 + $0x84] ss:$8 sps:$4 sm:$0xff]  }
  0x19   :  { %237 = vmatprep.subr.bf16.mxu0 %v917_v4  ;;  %v960_v18 = vld [vmem:[#allocation2 + $0x100] ss:$8 sps:$4 sm:$0xff]   ;;  %852 = vmatprep.subr.bf16.mxu1 %v959_v17  ;;  %v962_v21 = vld [vmem:[#allocation2 + $0x110] ss:$8 sps:$4 sm:$0xff]   ;;  %v938_v27 = vld [vmem:[#allocation2 + $0x94] ss:$8 sps:$4 sm:$0xff]  }
  0x1a   :  { %265 = vmatprep.mubr.bf16.mxu0 %v32_v16  ;;  %853 = vmatpush3.bf16.msra.mxu1 %v960_v18  ;;  %v963_v22 = vld [vmem:[#allocation2 + $0x1a0] ss:$8 sps:$4 sm:$0xff]   ;;  %v965_v26 = vld [vmem:[#allocation2 + $0x1b0] ss:$8 sps:$4 sm:$0xff]   ;;  %v941_v30 = vld [vmem:[#allocation2 + $0xa4] ss:$8 sps:$4 sm:$0xff]  }
  0x1b   :  { %854 = vmatprep.subr.bf16.mxu1 %v961_v19  ;;  %v937_v24 = vld [vmem:[#allocation2 + $0x80] ss:$8 sps:$4 sm:$0xff]   ;;  %v940_v28 = vld [vmem:[#allocation2 + $0x90] ss:$8 sps:$4 sm:$0xff]   ;;  %v944_v35 = vld [vmem:[#allocation2 + $0xb4] ss:$8 sps:$4 sm:$0xff]  }
  0x1c   :  { %238 = vmatpush1.bf16.msra.mxu0 %v919_v5  ;;  %v964_v25 = vld [vmem:[#allocation2 + $0x120] ss:$8 sps:$4 sm:$0xff]   ;;  %v966_v29 = vld [vmem:[#allocation2 + $0x130] ss:$8 sps:$4 sm:$0xff]   ;;  %v947_v38 = vld [vmem:[#allocation2 + $0xc4] ss:$8 sps:$4 sm:$0xff]  }
  0x1d   :  { %239 = vmatprep.subr.bf16.mxu0 %v920_v6  ;;  %v967_v31 = vld [vmem:[#allocation2 + $0x1c0] ss:$8 sps:$4 sm:$0xff]   ;;  %v969_v34 = vld [vmem:[#allocation2 + $0x1d0] ss:$8 sps:$4 sm:$0xff]   ;;  %v950_v40 = vld [vmem:[#allocation2 + $0xd4] ss:$8 sps:$4 sm:$0xff]  }
  0x1e   :  { %855 = vmatpush3.bf16.msra.mxu1 %v962_v21  ;;  %v968_v32 = vld [vmem:[#allocation2 + $0x140] ss:$8 sps:$4 sm:$0xff]   ;;  %v970_v36 = vld [vmem:[#allocation2 + $0x150] ss:$8 sps:$4 sm:$0xff]   ;;  %v953_v42 = vld [vmem:[#allocation2 + $0xe4] ss:$8 sps:$4 sm:$0xff]  }
  0x1f   :  { %856 = vmatprep.subr.bf16.mxu1 %v963_v22  ;;  %v943_v33 = vld [vmem:[#allocation2 + $0xa0] ss:$8 sps:$4 sm:$0xff]   ;;  %v946_v37 = vld [vmem:[#allocation2 + $0xb0] ss:$8 sps:$4 sm:$0xff]   ;;  %v956_v44 = vld [vmem:[#allocation2 + $0xf4] ss:$8 sps:$4 sm:$0xff]  }
  0x20   :  { %240 = vmatpush1.bf16.msra.mxu0 %v922_v7  ;;  %v949_v39 = vld [vmem:[#allocation2 + $0xc0] ss:$8 sps:$4 sm:$0xff]   ;;  %v952_v41 = vld [vmem:[#allocation2 + $0xd0] ss:$8 sps:$4 sm:$0xff]   ;;  %v1085_v54 = vshrl.u32 %v65_v53, 7  ;;  %vm1045_vm0 = vmmov 0  }
  0x21   :  { %241 = vmatprep.subr.bf16.mxu0 %v923_v8  ;;  %v955_v43 = vld [vmem:[#allocation2 + $0xe0] ss:$8 sps:$4 sm:$0xff]   ;;  %v958_v45 = vld [vmem:[#allocation2 + $0xf0] ss:$8 sps:$4 sm:$0xff]   ;;  %v975_v6 = vld [vmem:[#allocation2 + $0x104] ss:$8 sps:$4 sm:$0xff]  }
  0x22   :  { %857 = vmatpush3.bf16.msra.mxu1 %v964_v25  ;;  %v26_v46 = vld [vmem:[%s1126_s0] sm:$0xff]  ;;  %v973_v50 = vld [vmem:[#allocation2 + $0x1f0] ss:$8 sps:$4 sm:$0xff]   ;;  %v67_v57 = vsub.s32 0, %v1085_v54  ;;  %v976_v8 = vld [vmem:[#allocation2 + $0x114] ss:$8 sps:$4 sm:$0xff]  }
  0x23   :  { %858 = vmatprep.subr.bf16.mxu1 %v965_v26  ;;  %v31_v47 = vpack.c.bf16 %v26_v46, %v26_v46  ;;  %v971_v48 = vld [vmem:[#allocation2 + $0x1e0] ss:$8 sps:$4 sm:$0xff]   ;;  %v974_v51 = vld [vmem:[#allocation2 + $0x170] ss:$8 sps:$4 sm:$0xff]   ;;  %v985_v17 = vld [vmem:[#allocation2 + $0x204] ss:$8 sps:$4 sm:$0xff]  }
  0x24   :  { %242 = vmatpush1.bf16.msra.mxu0 %v925_v9  ;;  %v972_v49 = vld [vmem:[#allocation2 + $0x160] ss:$8 sps:$4 sm:$0xff]   ;;  %v977_v9 = vld [vmem:[#allocation2 + $0x124] ss:$8 sps:$4 sm:$0xff]   ;;  %v988_v18 = vld [vmem:[#allocation2 + $0x214] ss:$8 sps:$4 sm:$0xff]  }
  0x25   :  { %243 = vmatprep.subr.bf16.mxu0 %v926_v10  ;;  %v1087_v55 = vld [vmem:[#allocation2 + $0x280] sm:$0xff]  ;;  %v978_v10 = vld [vmem:[#allocation2 + $0x134] ss:$8 sps:$4 sm:$0xff]   ;;  %v986_v19 = vld [vmem:[#allocation2 + $0x210] ss:$8 sps:$4 sm:$0xff]   ;;  %s1047_s0 = smov 64  }
  0x26   :  { %859 = vmatpush3.bf16.msra.mxu1 %v966_v29  ;;  %v1090_v56 = vunpack.c.l.bf16 %v1087_v55  ;;  %v30_v58 = vunpack.c.h.bf16 %v1087_v55  ;;  %v983_v16 = vld [vmem:[#allocation2 + $0x200] ss:$8 sps:$4 sm:$0xff]   ;;  %v994_v22 = vld [vmem:[#allocation2 + $0x234] ss:$8 sps:$4 sm:$0xff]   ;;  %vm720_vm1 = vcmask 1048064   ;;  %vm731_vm2 = vcmask 523264  }
  0x27   :  { %860 = vmatprep.subr.bf16.mxu1 %v967_v31  ;;  %v989_v21 = vld [vmem:[#allocation2 + $0x220] ss:$8 sps:$4 sm:$0xff]   ;;  %v1000_v26 = vld [vmem:[#allocation2 + $0x254] ss:$8 sps:$4 sm:$0xff]  }
  0x28   :  { %244 = vmatpush1.bf16.msra.mxu0 %v928_v11  ;;  %v68_v59 = vrot.slane %v1090_v56, %v67_v57  ;;  %v72_v60 = vrot.slane %v30_v58, %v67_v57  ;;  %v979_v11 = vld [vmem:[#allocation2 + $0x144] ss:$8 sps:$4 sm:$0xff]   ;;  %v995_v25 = vld [vmem:[#allocation2 + $0x240] ss:$8 sps:$4 sm:$0xff]  }
  0x29   :  { %245 = vmatprep.subr.bf16.mxu0 %v929_v12  ;;  %v980_v12 = vld [vmem:[#allocation2 + $0x154] ss:$8 sps:$4 sm:$0xff]   ;;  %v1001_v29 = vld [vmem:[#allocation2 + $0x260] ss:$8 sps:$4 sm:$0xff]  }
  0x2a   :  { %861 = vmatpush3.bf16.msra.mxu1 %v968_v32 }
  0x2b   :  { %862 = vmatprep.subr.bf16.mxu1 %v969_v34 }
  0x2c   :  { %246 = vmatpush1.bf16.msra.mxu0 %v931_v13  ;;  %v981_v13 = vld [vmem:[#allocation2 + $0x164] ss:$8 sps:$4 sm:$0xff]  }
  0x2d   :  { %247 = vmatprep.subr.bf16.mxu0 %v932_v15  ;;  %v982_v15 = vld [vmem:[#allocation2 + $0x174] ss:$8 sps:$4 sm:$0xff]  }
  0x2e   :  { %863 = vmatpush3.bf16.msra.mxu1 %v970_v36 }
  0x2f   :  { %864 = vmatprep.subr.bf16.mxu1 %v971_v48 }
  0x30   :  { %248 = vmatpush1.bf16.msra.mxu0 %v934_v20  ;;  %v991_v20 = vld [vmem:[#allocation2 + $0x224] ss:$8 sps:$4 sm:$0xff]  }
  0x31   :  { %249 = vmatprep.subr.bf16.mxu0 %v935_v23  ;;  %v992_v23 = vld [vmem:[#allocation2 + $0x230] ss:$8 sps:$4 sm:$0xff]  }
  0x32   :  { %865 = vmatpush3.bf16.msra.mxu1 %v972_v49 }
  0x33   :  { %866 = vmatprep.subr.bf16.mxu1 %v973_v50 }
  0x34   :  { %250 = vmatpush1.bf16.msra.mxu0 %v937_v24  ;;  %v997_v24 = vld [vmem:[#allocation2 + $0x244] ss:$8 sps:$4 sm:$0xff]  }
  0x35   :  { %251 = vmatprep.subr.bf16.mxu0 %v938_v27  ;;  %v998_v27 = vld [vmem:[#allocation2 + $0x250] ss:$8 sps:$4 sm:$0xff]  }
  0x36   :  { %867 = vmatpush3.bf16.msra.mxu1 %v974_v51 }
  0x37   :  { %883 = vmatprep.subr.bf16.mxu1 %v1044_v52 }
  0x38   :  { %252 = vmatpush1.bf16.msra.mxu0 %v940_v28  ;;  %v1003_v28 = vld [vmem:[#allocation2 + $0x264] ss:$8 sps:$4 sm:$0xff]  }
  0x39   :  { %253 = vmatprep.subr.bf16.mxu0 %v941_v30  ;;  %v312_v30 = vsub.s32 1, %v1085_v54 }
  0x3b   :  { %v313_v32 = vrot.slane %v1090_v56, %v312_v30 }
  0x3c   :  { %254 = vmatpush1.bf16.msra.mxu0 %v943_v33 }
  0x3d   :  { %255 = vmatprep.subr.bf16.mxu0 %v944_v35 }
  0x40   :  { %256 = vmatpush1.bf16.msra.mxu0 %v946_v37 }
  0x41   :  { %257 = vmatprep.subr.bf16.mxu0 %v947_v38 }
  0x44   :  { %258 = vmatpush1.bf16.msra.mxu0 %v949_v39 }
  0x45   :  { %259 = vmatprep.subr.bf16.mxu0 %v950_v40  ;;  %v1006_v40 = vld [vmem:[#allocation2 + $0x274] ss:$8 sps:$4 sm:$0xff]  }
  0x48   :  { %260 = vmatpush1.bf16.msra.mxu0 %v952_v41  ;;  %v1004_v41 = vld [vmem:[#allocation2 + $0x270] ss:$8 sps:$4 sm:$0xff]  }
  0x49   :  { %261 = vmatprep.subr.bf16.mxu0 %v953_v42  ;;  %v1046_v42 = vmov 0  }
  0x4a   :  { %910 = vset.pattern.permute.xlu0 %v1046_v42 }
  0x4c   :  { %262 = vmatpush1.bf16.msra.mxu0 %v955_v43  ;;  %v470_v43 = vsub.s32 2, %v1085_v54 }
  0x4d   :  { %263 = vmatprep.subr.bf16.mxu0 %v956_v44 }
  0x4e   :  { %v471_v44 = vrot.slane %v1090_v56, %v470_v43 }
  0x50   :  { %264 = vmatpush1.bf16.msra.mxu0 %v958_v45 }
  0x51   :  { %666 = vmatprep.subr.bf16.mxu0 %v985_v17  ;;  %v746_v17 = vsub.s32 4, %v1085_v54 }
  0x53   :  { %266 = vmatmul.mubr.bf16.vlgmr.msra.gmra.mrb[0].mxu0 %v31_v47 }
  0x54   :  { %667 = vmatpush1.bf16.msra.mxu0 %v983_v16  ;;  %698 = vmatprep.mubr.bf16.mxu0 %v1046_v42 }
  0x55   :  { %668 = vmatprep.subr.bf16.mxu0 %v988_v18 }
  0x58   :  { %669 = vmatpush1.bf16.msra.mxu0 %v986_v19  ;;  %v747_v19 = vrot.slane %v1090_v56, %v746_v17 }
  0x59   :  { %670 = vmatprep.subr.bf16.mxu0 %v991_v20 }
  0x5c   :  { %671 = vmatpush1.bf16.msra.mxu0 %v989_v21 }
  0x5d   :  { %672 = vmatprep.subr.bf16.mxu0 %v994_v22 }
  0x60   :  { %673 = vmatpush1.bf16.msra.mxu0 %v992_v23 }
  0x61   :  { %674 = vmatprep.subr.bf16.mxu0 %v997_v24  ;;  %v754_v24 = vsub.s32 5, %v1085_v54 }
  0x64   :  { %675 = vmatpush1.bf16.msra.mxu0 %v995_v25  ;;  %v755_v25 = vrot.slane %v1090_v56, %v754_v24 }
  0x65   :  { %676 = vmatprep.subr.bf16.mxu0 %v1000_v26 }
  0x68   :  { %677 = vmatpush1.bf16.msra.mxu0 %v998_v27 }
  0x69   :  { %678 = vmatprep.subr.bf16.mxu0 %v1003_v28 }
  0x6c   :  { %679 = vmatpush1.bf16.msra.mxu0 %v1001_v29 }
  0x6d   :  { %680 = vmatprep.subr.bf16.mxu0 %v1006_v40 }
  0x70   :  { %681 = vmatpush1.bf16.msra.mxu0 %v1004_v41 }
 0x126   :  { %v267_v61 = vpop.f32.mrb[0].mxu0 }
 0x127   :  { %v268_v62 = vadd.f32 %v267_v61, %v68_v59  ;;  %v269_v63 = vpop.f32.mrb[1].mxu0 }
 0x128   :  { %v270_v0 = vadd.f32 %v269_v63, %v72_v60  ;;  %v271_v1 = vpop.f32.mrb[2].mxu0 }
 0x129   :  { %v274_v2 = vmax.f32 %v268_v62, 0.0  ;;  %v272_v3 = vpop.f32.mrb[3].mxu0 }
 0x12a   :  { %v275_v4 = vmax.f32 %v270_v0, 0.0 }
 0x12b   :  { %v276_v7 = vpack.c.bf16 %v274_v2, %v274_v2 }
 0x12c   :  { %v277_v5 = vpack.c.bf16 %v275_v4, %v275_v4 }
 0x12e   :  { %442 = vmatprep.mubr.bf16.mxu1 %v277_v5 }
 0x12f   :  { %443 = vmatmul.mubr.bf16.vlgmr.msra.gmra.mrb[0].mxu1 %v276_v7 }
 0x130   :  { %884 = vmatpush3.bf16.msra.mxu1 %v975_v6  ;;  %899 = vmatprep.mubr.msk.bf16.mxu1 %vm1045_vm0, %v1044_v52 }
 0x131   :  { %885 = vmatprep.subr.bf16.mxu1 %v1044_v52 }
 0x134   :  { %886 = vmatpush3.bf16.msra.mxu1 %v976_v8 }
 0x135   :  { %887 = vmatprep.subr.bf16.mxu1 %v1044_v52 }
 0x138   :  { %888 = vmatpush3.bf16.msra.mxu1 %v977_v9 }
 0x139   :  { %889 = vmatprep.subr.bf16.mxu1 %v1044_v52 }
 0x13c   :  { %890 = vmatpush3.bf16.msra.mxu1 %v978_v10 }
 0x13d   :  { %891 = vmatprep.subr.bf16.mxu1 %v1044_v52 }
 0x140   :  { %892 = vmatpush3.bf16.msra.mxu1 %v979_v11 }
 0x141   :  { %893 = vmatprep.subr.bf16.mxu1 %v1044_v52 }
 0x144   :  { %894 = vmatpush3.bf16.msra.mxu1 %v980_v12 }
 0x145   :  { %895 = vmatprep.subr.bf16.mxu1 %v1044_v52 }
 0x148   :  { %896 = vmatpush3.bf16.msra.mxu1 %v981_v13 }
 0x149   :  { %897 = vmatprep.subr.bf16.mxu1 %v1044_v52  ;;  %v580_v52 = vsub.s32 3, %v1085_v54 }
 0x14b   :  { %v585_v53 = vrot.slane %v30_v58, %v580_v52  ;;  %v581_v0 = vrot.slane %v1090_v56, %v580_v52 }
 0x14c   :  { %898 = vmatpush3.bf16.msra.mxu1 %v982_v15 }
 0x202   :  { %v868_v31 = vpop.f32.mrb[0].mxu1 }
 0x203   :  { %v869_v33 = vpop.f32.mrb[1].mxu1 }
 0x204   :  { %v870_v34 = vadd.f32 %v869_v33, %v868_v31  ;;  %v871_v35 = vpop.f32.mrb[2].mxu1 }
 0x205   :  { %v872_v36 = vpop.f32.mrb[3].mxu1 }
 0x206   :  { %v445_v37 = vadd.f32 %v870_v34, %v313_v32 }
 0x208   :  { %v450_v38 = vmax.f32 %v445_v37, 0.0 }
 0x20a   :  { %v451_v39 = vpack.c.bf16 %v450_v38, %v450_v38 }
 0x20c   :  { %900 = vmatmul.mubr.bf16.vlgmr.msra.gmra.mrb[4].mxu1 %v451_v39 }
 0x2df   :  { %v554_v45 = vpop.f32.mrb[4].mxu1 }
 0x2e0   :  { %v555_v46 = vadd.f32 %v554_v45, %v471_v44  ;;  %v901_v47 = vpop.f32.mrb[5].mxu1 }
 0x2e1   :  { %v557_v48 = vpop.f32.mrb[6].mxu1 }
 0x2e2   :  { %v560_v49 = vmax.f32 %v555_v46, 0.0  ;;  %v902_v50 = vpop.f32.mrb[7].mxu1 }
 0x2e4   :  { %v561_v51 = vpack.c.bf16 %v560_v49, %v560_v49  ;;  %v737_v18 = vmul.f32 0.4, %v560_v49 }
 0x2e6   :  { %699 = vmatmul.mubr.bf16.vlgmr.msra.gmra.mrb[4].mxu0 %v561_v51 }
 0x3b9   :  { %v700_v57 = vpop.f32.mrb[4].mxu0 }
 0x3ba   :  { %v702_v59 = vpop.f32.mrb[5].mxu0  ;;  %v701_v2 = vadd.f32 %v700_v57, %v581_v0 }
 0x3bb   :  { %v703_v60 = vadd.f32 %v702_v59, %v585_v53  ;;  %v704_v61 = vpop.f32.mrb[6].mxu0 }
 0x3bc   :  { %v705_v62 = vpop.f32.mrb[7].mxu0 }
 0x3bd   :  { %v707_v63 = vmul.f32 1.442695, %v703_v60 }
 0x3bf   :  { %1007 = vpow2.f32 %v707_v63 }
 0x3c9   :  { %v1008_v1 = vpop.eup %1007 }
 0x3ca   :  { %710 = vrot.lane.b32.xlu0 %v1008_v1, %s1047_s0 }
 0x3ce   :  { %716 = vrot.lane.b32.xlu0 %v701_v2, %s1047_s0 }
 0x43c   :  { %v711_v3 = vpop.permute.xlu0 %710 }
 0x43d   :  { %v713_v55 = vmul.f32 %v711_v3, %v1078_v14 }
 0x43f   :  { %v714_v58 = vadd.f32 %v713_v55, %v701_v2 }
 0x440   :  { %v717_v4 = vpop.permute.xlu0 %716 }
 0x441   :  { %v719_v5 = vadd.f32 %v717_v4, %v714_v58 }
 0x443   :  { %v721_v6 = vsel %vm720_vm1, %v719_v5, -inf }
 0x444   :  { %722 = vmax.xlane.f32.xlu1 %v721_v6 }
 0x4d1   :  { %v723_v7 = vpop.xlane.xlu1 %722 }
 0x4d2   :  { %v724_v8 = vsub.f32 %v719_v5, %v723_v7 }
 0x4d4   :  { %v725_v9 = vmul.f32 1.442695, %v724_v8 }
 0x4d6   :  { %1009 = vpow2.f32 %v725_v9 }
 0x4e0   :  { %v1010_v10 = vpop.eup %1009 }
 0x4e1   :  { %728 = vrot.lane.b32.xlu1 %v1010_v10, %s1047_s0 }
 0x553   :  { %v729_v11 = vpop.permute.xlu1 %728 }
 0x554   :  { %v732_v12 = vsel %vm731_vm2, %v729_v11, 0.0 }
 0x555   :  { %733 = vadd.xlane.f32.xlu0 %v732_v12 }
 0x5e2   :  { %v734_v14 = vpop.xlane.xlu0 %733 }
 0x5e3   :  { %1011 = vrcp.f32 %v734_v14 }
 0x5ed   :  { %v1012_v13 = vpop.eup %1011 }
 0x5ee   :  { %v736_v15 = vmul.f32 %v1012_v13, %v1010_v10 }
 0x5f0   :  { %v738_v16 = vmul.f32 0.6, %v736_v15 }
 0x5f2   :  { %740 = vrot.lane.b32.xlu1 %v738_v16, %s1047_s0 }
 0x664   :  { %v741_v20 = vpop.permute.xlu1 %740 }
 0x665   :  { %v743_v21 = vadd.f32 %v741_v20, %v737_v18 }
 0x667   :  { %v748_v22 = vmul.f32 %v747_v19, %v743_v21 }
 0x669   :  { %v749_v23 = vsel %vm731_vm2, %v748_v22, 0.0 }
 0x66a   :  { %750 = vadd.xlane.f32.xlu1 %v749_v23 }
 0x67b   :  { %765 = vrot.lane.b32.xlu1 %v719_v5, %s1047_s0 }
 0x6f7   :  { %v751_v26 = vpop.xlane.xlu1 %750 }
 0x6f8   :  { %v756_v27 = vadd.f32 %v755_v25, %v751_v26 }
 0x6fa   :  { %v757_v28 = vsub.f32 0.0, %v756_v27 }
 0x6fb   :  { %v766_v29 = vpop.permute.xlu1 %765 }
 0x6fc   :  { %v758_v30 = vmul.f32 1.442695, %v757_v28  ;;  %768 = vst.msk [vmem:[%s1128_s2] sm:$0xff] %vm731_vm2, %v766_v29 }
 0x6fe   :  { %1013 = vpow2.f32 %v758_v30 }
 0x708   :  { %v1014_v31 = vpop.eup %1013 }
 0x709   :  { %v760_v32 = vadd.f32 1.0, %v1014_v31 }
 0x70b   :  { %1015 = vrcp.f32 %v760_v32 }
 0x715   :  { %v1016_v33 = vpop.eup %1015 }
 0x716   :  { %v762_v34 = vmax.f32 %v1016_v33, 0.0 }
 0x718   :  { %v763_v35 = vmin.f32 %v762_v34, 1.0 }
 0x71a   :  { %771 = vperm.xlu0 %910, %v763_v35  }
 0x799   :  { %v772_v54 = vpop.permute.xlu0 %771 }
 0x79a   :  { %774 = vst.msk [vmem:[%s1128_s2] sm:$0xff] %vm720_vm1, %v772_v54 }
 0x79b   :  { %779 = vsyncpa [#allocation3], 1 }

</bundles_post_ra>
